<compile_context>
chip_gen: v6e
topology: v6e:2x2x1
jax: 0.10.0
libtpu: 0.0.40
codegen_flags: <defaults>
</compile_context>

<pallas_src>
import functools

import jax
import jax.numpy as jnp
from jax import lax
from jax.experimental import pallas as pl
from jax.experimental.pallas import tpu as pltpu

_EPS = 1e-5


def _ln_nchw_kernel(x_ref, w_ref, *rest, inv_c, with_bias):
    """Channel LayerNorm on an NCHW block.

    x_ref: (1, C, T) — C on the sublane axis, T spatial positions on lanes.
    Mean/var are sublane reductions (XLU); every load/store is lane-dense.
    """
    if with_bias:
        b_ref, o_ref = rest
    else:
        (o_ref,) = rest

    x = x_ref[...].astype(jnp.float32)                    # (1, C, T)
    mu = jnp.sum(x, axis=1, keepdims=True) * inv_c        # (1, 1, T)
    xc = x - mu
    var = jnp.sum(xc * xc, axis=1, keepdims=True) * inv_c  # population variance
    # One fused per-(channel, position) scale: rsqrt(var+eps) * weight.
    scale = lax.rsqrt(var + _EPS) * w_ref[...].astype(jnp.float32)  # (1, C, T)
    if with_bias:
        y = xc * scale + b_ref[...].astype(jnp.float32)    # WithBias_LayerNorm
    else:
        y = x * scale                                      # BiasFree_LayerNorm
    o_ref[...] = y.astype(o_ref.dtype)


def _pick_tile_hw(hw, c, itemsize, target_bytes):
    """Lane tile for the spatial axis: ~target_bytes per block, multiple of 128
    lanes (or the full axis when it already fits / is tiny)."""
    per_lane = c * itemsize
    if hw <= 128 or hw * per_lane <= target_bytes:
        return int(hw)                      # full extent == full dim: always legal
    lanes = max(128, (target_bytes // per_lane) // 128 * 128)
    return int(min(lanes, (hw // 128) * 128))


def layernorm_4d(x, weight, bias=None, *, bias_free=False,
                 target_block_bytes=2 * 1024 * 1024):
    """PyTorch `LayerNorm(dim, LayerNorm_type)` module on NCHW input.

    Equivalent to to_3d -> {WithBias,BiasFree}_LayerNorm -> to_4d, but computed
    directly in the NCHW layout (normalization over the channel dim), so no
    transpose passes over HBM are needed.

    x: (B, C, H, W); weight: (C,); bias: (C,) or None.
    """
    B, C, H, W = x.shape
    HW = H * W
    x3 = x.reshape(B, C, HW)                       # free row-major view, no copy
    itemsize = jnp.dtype(x.dtype).itemsize
    tile = _pick_tile_hw(HW, C, itemsize, target_block_bytes)
    grid = (B, pl.cdiv(HW, tile))
    with_bias = not bias_free

    operands = [x3, weight.reshape(1, C, 1)]
    in_specs = [
        pl.BlockSpec((1, C, tile), lambda b, j: (b, 0, j)),
        pl.BlockSpec((1, C, 1), lambda b, j: (0, 0, 0)),
    ]
    if with_bias:
        if bias is None:
            bias = jnp.zeros((C,), dtype=weight.dtype)
        operands.append(bias.reshape(1, C, 1))
        in_specs.append(pl.BlockSpec((1, C, 1), lambda b, j: (0, 0, 0)))

    kernel = functools.partial(_ln_nchw_kernel, inv_c=1.0 / C,
                               with_bias=with_bias)
    nbytes = B * C * HW * itemsize
    cost = pl.CostEstimate(
        flops=int(8 * B * C * HW),
        transcendentals=int(B * HW),
        bytes_accessed=int(2 * nbytes),
    )
    out = pl.pallas_call(
        kernel,
        out_shape=jax.ShapeDtypeStruct((B, C, HW), x.dtype),
        grid_spec=pltpu.PrefetchScalarGridSpec(
            num_scalar_prefetch=0,
            grid=grid,
            in_specs=in_specs,
            out_specs=pl.BlockSpec((1, C, tile), lambda b, j: (b, 0, j)),
        ),
        compiler_params=pltpu.CompilerParams(
            # Both axes write disjoint output blocks -> shard across TCs/megacore.
            dimension_semantics=("parallel", "parallel"),
            vmem_limit_bytes=32 * 1024 * 1024,
        ),
        cost_estimate=cost,
    )(*operands)
    return out.reshape(B, C, H, W)


def _ref_layernorm_module(x, weight, bias=None, bias_free=False):
    """Pure-JAX reference that mirrors the PyTorch module literally:
    to_3d -> LayerNorm over last dim -> to_4d."""
    b, c, h, w = x.shape
    x3 = jnp.transpose(x, (0, 2, 3, 1)).reshape(b, h * w, c).astype(jnp.float32)
    mu = jnp.mean(x3, axis=-1, keepdims=True)
    var = jnp.mean((x3 - mu) ** 2, axis=-1, keepdims=True)   # unbiased=False
    inv = 1.0 / jnp.sqrt(var + _EPS)
    wf = weight.astype(jnp.float32)
    if bias_free:
        y = x3 * inv * wf
    else:
        y = (x3 - mu) * inv * wf + bias.astype(jnp.float32)
    y = y.astype(x.dtype)
    return jnp.transpose(y.reshape(b, h, w, c), (0, 3, 1, 2))


if __name__ == "__main__":
    key = jax.random.PRNGKey(0)
    k1, k2, k3, kw, kb = jax.random.split(key, 5)

    # --- EncoderLayer3.norm1 / norm2 style input: (B, C, H, W), LN over C. ---
    B, C, H, W = 2, 48, 16, 16
    x = jax.random.normal(k1, (B, C, H, W), dtype=jnp.float32)
    weight = 1.0 + 0.1 * jax.random.normal(kw, (C,), dtype=jnp.float32)
    bias = 0.1 * jax.random.normal(kb, (C,), dtype=jnp.float32)

    out = jax.block_until_ready(layernorm_4d(x, weight, bias))
    ref = _ref_layernorm_module(x, weight, bias)
    assert out.shape == x.shape and out.dtype == x.dtype
    assert jnp.allclose(out, ref, atol=1e-4, rtol=1e-4)

    # --- BiasFree variant (LayerNorm_type='BiasFree'). ---
    out_bf = jax.block_until_ready(layernorm_4d(x, weight, bias_free=True))
    ref_bf = _ref_layernorm_module(x, weight, bias_free=True)
    assert jnp.allclose(out_bf, ref_bf, atol=1e-4, rtol=1e-4)

    # --- Ragged spatial tiling: HW=400 with a forced 128-lane tile. ---
    C2 = 32
    x2 = jax.random.normal(k2, (1, C2, 20, 20), dtype=jnp.float32)
    w2 = 1.0 + 0.1 * jax.random.normal(kw, (C2,), dtype=jnp.float32)
    b2 = 0.1 * jax.random.normal(kb, (C2,), dtype=jnp.float32)
    out2 = jax.block_until_ready(
        layernorm_4d(x2, w2, b2, target_block_bytes=8 * 1024))
    assert jnp.allclose(out2, _ref_layernorm_module(x2, w2, b2),
                        atol=1e-4, rtol=1e-4)

    # --- bf16 input / params. ---
    x3 = jax.random.normal(k3, (2, C2, 16, 16), dtype=jnp.bfloat16)
    w3 = w2.astype(jnp.bfloat16)
    b3 = b2.astype(jnp.bfloat16)
    out3 = jax.block_until_ready(layernorm_4d(x3, w3, b3))
    ref3 = _ref_layernorm_module(x3, w3, b3)
    assert out3.dtype == jnp.bfloat16
    assert jnp.allclose(out3.astype(jnp.float32), ref3.astype(jnp.float32),
                        atol=3e-2, rtol=3e-2)

    print("KERNEL_OK")
</pallas_src>

<mosaic_0001>
module attributes {stable_mosaic.version = 11 : i64} {
  func.func @_ln_nchw_kernel(%arg0: i32, %arg1: i32, %arg2: memref<1x48x256xf32, #tpu.memory_space<vmem>>, %arg3: memref<1x48x1xf32, #tpu.memory_space<vmem>>, %arg4: memref<1x48x1xf32, #tpu.memory_space<vmem>>, %arg5: memref<1x48x256xf32, #tpu.memory_space<vmem>>) attributes {dimension_semantics = [#tpu.dimension_semantics<parallel>, #tpu.dimension_semantics<parallel>], iteration_bounds = array<i64: 2, 1>, scalar_prefetch = 0 : i64, scratch_operands = 0 : i64, tpu.core_type = #tpu.core_type<tc>, window_params = [{transform_indices = @transform_0, window_bounds = array<i64: 1, 48, 256>}, {pipeline_mode = #tpu.pipeline_mode<synchronous>, transform_indices = @transform_1, window_bounds = array<i64: 1, 48, 1>}, {pipeline_mode = #tpu.pipeline_mode<synchronous>, transform_indices = @transform_2, window_bounds = array<i64: 1, 48, 1>}, {transform_indices = @transform_3, window_bounds = array<i64: 1, 48, 256>}]} {
    %c0 = arith.constant 0 : index
    %c0_0 = arith.constant 0 : index
    %c0_1 = arith.constant 0 : index
    %0 = vector.load %arg2[%c0, %c0_0, %c0_1] : memref<1x48x256xf32, #tpu.memory_space<vmem>>, vector<1x48x256xf32>
    %cst = arith.constant dense<0.000000e+00> : vector<1x256xf32>
    %1 = vector.multi_reduction <add>, %0, %cst [1] : vector<1x48x256xf32> to vector<1x256xf32>
    %2 = vector.shape_cast %1 : vector<1x256xf32> to vector<1x1x256xf32>
    %cst_2 = arith.constant 0.020833334 : f32
    %3 = vector.broadcast %cst_2 : f32 to vector<1x1x256xf32>
    %4 = arith.mulf %2, %3 : vector<1x1x256xf32>
    %5 = vector.broadcast %4 : vector<1x1x256xf32> to vector<1x48x256xf32>
    %6 = arith.subf %0, %5 : vector<1x48x256xf32>
    %7 = arith.mulf %6, %6 : vector<1x48x256xf32>
    %cst_3 = arith.constant dense<0.000000e+00> : vector<1x256xf32>
    %8 = vector.multi_reduction <add>, %7, %cst_3 [1] : vector<1x48x256xf32> to vector<1x256xf32>
    %9 = vector.shape_cast %8 : vector<1x256xf32> to vector<1x1x256xf32>
    %cst_4 = arith.constant 0.020833334 : f32
    %10 = vector.broadcast %cst_4 : f32 to vector<1x1x256xf32>
    %11 = arith.mulf %9, %10 : vector<1x1x256xf32>
    %cst_5 = arith.constant 9.99999974E-6 : f32
    %12 = vector.broadcast %cst_5 : f32 to vector<1x1x256xf32>
    %13 = arith.addf %11, %12 : vector<1x1x256xf32>
    %14 = math.rsqrt %13 : vector<1x1x256xf32>
    %c0_6 = arith.constant 0 : index
    %c0_7 = arith.constant 0 : index
    %c0_8 = arith.constant 0 : index
    %15 = vector.load %arg3[%c0_6, %c0_7, %c0_8] : memref<1x48x1xf32, #tpu.memory_space<vmem>>, vector<1x48x1xf32>
    %16 = vector.broadcast %14 : vector<1x1x256xf32> to vector<1x48x256xf32>
    %17 = vector.broadcast %15 : vector<1x48x1xf32> to vector<1x48x256xf32>
    %18 = arith.mulf %16, %17 : vector<1x48x256xf32>
    %19 = arith.mulf %6, %18 : vector<1x48x256xf32>
    %c0_9 = arith.constant 0 : index
    %c0_10 = arith.constant 0 : index
    %c0_11 = arith.constant 0 : index
    %20 = vector.load %arg4[%c0_9, %c0_10, %c0_11] : memref<1x48x1xf32, #tpu.memory_space<vmem>>, vector<1x48x1xf32>
    %21 = vector.broadcast %20 : vector<1x48x1xf32> to vector<1x48x256xf32>
    %22 = arith.addf %19, %21 : vector<1x48x256xf32>
    %c0_12 = arith.constant 0 : index
    %c0_13 = arith.constant 0 : index
    %c0_14 = arith.constant 0 : index
    %23 = vector.load %arg5[%c0_12, %c0_13, %c0_14] : memref<1x48x256xf32, #tpu.memory_space<vmem>>, vector<1x48x256xf32>
    tpu.vector_store %arg5[%c0_12, %c0_13, %c0_14], %22 {strides = array<i32>} : memref<1x48x256xf32, #tpu.memory_space<vmem>>, vector<1x48x256xf32>,
    return
  }
  func.func @transform_0(%arg0: i32, %arg1: i32) -> (i32, i32, i32) {
    %c0_i32 = arith.constant 0 : i32
    %c0_i32_0 = arith.constant 0 : i32
    return %arg0, %c0_i32, %arg1 : i32, i32, i32
  }
  func.func @transform_1(%arg0: i32, %arg1: i32) -> (i32, i32, i32) {
    %c0_i32 = arith.constant 0 : i32
    %c0_i32_0 = arith.constant 0 : i32
    %c0_i32_1 = arith.constant 0 : i32
    %c0_i32_2 = arith.constant 0 : i32
    return %c0_i32, %c0_i32_0, %c0_i32_1 : i32, i32, i32
  }
  func.func @transform_2(%arg0: i32, %arg1: i32) -> (i32, i32, i32) {
    %c0_i32 = arith.constant 0 : i32
    %c0_i32_0 = arith.constant 0 : i32
    %c0_i32_1 = arith.constant 0 : i32
    %c0_i32_2 = arith.constant 0 : i32
    return %c0_i32, %c0_i32_0, %c0_i32_1 : i32, i32, i32
  }
  func.func @transform_3(%arg0: i32, %arg1: i32) -> (i32, i32, i32) {
    %c0_i32 = arith.constant 0 : i32
    %c0_i32_0 = arith.constant 0 : i32
    return %arg0, %c0_i32, %arg1 : i32, i32, i32
  }
}

</mosaic_0001>

<bundles_post_ra>
// kernel: tpu_custom_call.1
= control target key start
LH: loop header
LB: loop body
LE: loop exit
PB: predicated region body
PF: predicated region fallthrough
CT: control target
= control target key end

     0   :  { %8 = vsyncpa [#allocation3], 0  ;;  %s1018_s0 = inlined_call_operand.hbm [shape: f32[2,48,256], index: 0, kind: input, shape index: {}]   ;;  %s1019_s1 = inlined_call_operand.vmem [shape: f32[1,48,1], index: 1, kind: input, shape index: {}]   ;;  %s1020_s2 = inlined_call_operand.vmem [shape: f32[1,48,1], index: 2, kind: input, shape index: {}]   ;;  %s1021_s3 = inlined_call_operand.hbm [shape: f32[2,48,256], index: 3, kind: output, shape index: {}]  }
   0x1   :  { %10 = vsyncpa [#allocation3 + $0x1], 0 }
   0x2   :  { %11 = vsyncpa [#allocation4], 0 }
   0x3   :  { %13 = vsyncpa [#allocation4 + $0x1], 0  ;;  %s743_s12 = smov 0   ;;  %s745_s13 = smov 0  }
   0x4   :  { %s747_s14 = smov 0   ;;  %s749_s15 = smov 0  }
   0x5   :  { %s751_s16 = smov 0   ;;  %s753_s17 = smov 0  }
   0x6 LB: > { %s520_s18 = sadd.s32 4294967295, %s714_s17   ;;  %s521_s19 = sadd.s32 4294967294, %s714_s17   ;;  %s714_s17 = sphi %s753_s17, %s19_s17   ;;  %s710_s16 = sphi %s751_s16, %s1032_s16   ;;  %s706_s15 = sphi %s749_s15, %s1031_s15   ;;  %s702_s14 = sphi %s747_s14, %s1030_s14   ;;  %s698_s13 = sphi %s745_s13, %s1029_s13   ;;  %s694_s12 = sphi %s743_s12, %s1028_s12  }
   0x7   : > { %s31_s20 = sadd.s32 1, %s710_s16  ;;  %s40_s21 = sadd.s32 1, %s702_s14 }
   0x8   : > { %p33_p0 = scmp.ge.s32.totalorder %s31_s20, 2  ;;  %p47_p1 = scmp.ne.s32.totalorder %s702_s14, %s698_s13 }
   0x9   : > { %p48_p2 = scmp.eq.s32.totalorder %s714_s17, 0  ;;  %p53_p3 = scmp.ne.s32.totalorder %s698_s13, %s694_s12 }
   0xa   : > { %s1034_s20 = smov (%p33_p0, %s31_s20), 0  ;;  %p54_p5 = scmp.eq.s32.totalorder %s520_s18, 0 }
   0xb   : > { %p784_p4 = por %p48_p2, %p47_p1  ;;  %s35_s23 = ssub.s32 %s710_s16, %s1034_s20 }
   0xc   : > { %p121_p6 = scmp.eq.s32.totalorder %s520_s18, 1  ;;  %p38_p7 = scmp.eq.s32.totalorder %s35_s23, 0 }
   0xd   : > { %p790_p8 = por %p54_p5, %p53_p3  ;;  %p127_p10 = scmp.eq.s32.totalorder %s521_s19, 1 }
   0xe   : > { %p794_p9 = por %p121_p6, %p47_p1  ;;  %p545_p13 = scmp.lt.s32.totalorder %s714_s17, 2 }
   0xf   : > { %s799_s26 = scalar_select %p38_p7, %s702_s14, %s40_s21  }
  0x10   : > { %p801_p11 = por %p127_p10, %p53_p3  ;;  %s153_s28 = sand.u32 1, %s702_s14  }
  0x11   : > { %s529_s29 = smul.u32 96, %s153_s28  ;;  %p811_p0 = pnand %p545_p13, %p784_p4 }
  0x12   : > { %s530_s30 = smul.u32 1536, %s710_s16  ;;  %p525_p1 = scmp.ge.s32.totalorder %s714_s17, 1 }
  0x13   : > { %s157_s8 = scalar_lea.vmem [#allocation2], %s529_s29  ;;  %s154_s10 = scalar_lea.sflag [#allocation3], %s153_s28 }
  0x14   : > { %s165_s7 = scalar_lea.hbm %s1018_s0, %s530_s30  ;;  %s166_s9 = sshll.u32 %s157_s8, 4  ;;  %s167_s9 = int_to_ptr.vmem [resolvable:$true] %s166_s9 }
  0x15   : > { %p608_p2 = pneg %p811_p0  ;;  %s619_s11 = scalar_lea.vmem %s167_s9, 1536 }
  0x16   : > { %p620_p3 = scmp.ne.s32.totalorder %s167_s9, %s619_s11  ;;  %s716_s18 = smov [#allocation2]  }
  0x17   : > { %s624_s19 = sshll.u32 %s716_s18, 4  ;;  %s625_s19 = int_to_ptr.vmem [resolvable:$false] %s624_s19 }
  0x18   : > { %p622_p5 = pnand %p620_p3, %p608_p2  ;;  %s626_s21 = scalar_lea.vmem %s625_s19, 3072 }
  0x19   : > { %p627_p4 = scmp.lt.s32.totalorder %s167_s9, %s625_s19  ;;  %p628_p7 = scmp.lt.s32.totalorder %s626_s21, %s619_s11 }
  0x1a   : > { %p623_p6 = pneg %p622_p5 }
  0x1b   : > { %p629_p10 = por %p628_p7, %p627_p4 }
  0x1d   : > { %p630_p13 = pnand %p629_p10, %p623_p6 }
  0x1f   : > { %633 = shalt.err (!%p630_p13)
}
  0x20   : > { %s717_s22 = smov 256   ;;  %s718_s23 = smov 16  }
  0x21   : > { %540 = dma.hbm_to_vmem [thread:$0]  (!%p811_p0), %s165_s7, 1536, %s167_s9, %s154_s10, %s717_s22, %s717_s22, %s718_s23  }
  0x22   : > { %p174_p12 = scmp.lt.s32.totalorder %s714_s17, 3 }
  0x24   : > { %p175_p2 = pnand %p525_p1, %p174_p12 }
  0x25   : > { %s827_s28 = sand.u32 (!%p175_p2), 1, %s698_s13  }
  0x26   : > { %178 = sbr.rel (%p175_p2) target bundleno = 207 (0xcf), region = 32  ;;  %s181_s30 = scalar_lea.sflag (!%p175_p2), [#allocation3], %s827_s28 }
  0x27   : > { %s531_s29 = smul.u32 (!%p175_p2), 96, %s827_s28 }
  0x29   : > { %s833_s5 = scalar_lea.vmem (!%p175_p2), [#allocation2], %s531_s29 }
  0x2b   : > { %685 = dma.done.wait (%p790_p8), %s181_s30, 1536  }
  0x2c   : > { %687 = vsyncadd (%p790_p8), %s181_s30, 4294965760  ;;  %v719_v0 = vmov 0   ;;  %v299_v1 = vld [vmem:[%s1019_s1 + $0x10] sm:$0xff]  ;;  %v297_v2 = vld [vmem:[%s1019_s1] sm:$0xff]  ;;  %s532_s21 = smul.u32 1536, %s706_s15  ;;  %s418_s30 = scalar_lea.sflag [#allocation4], %s827_s28 }
  0x2d   : > { %601 = vset.pattern.permute.xlu1 %v719_v0  ;;  %600 = vset.pattern.permute.xlu0 %v719_v0  ;;  %v300_v3 = vld [vmem:[%s1019_s1 + $0x18] sm:$0xff]  ;;  %v298_v4 = vld [vmem:[%s1019_s1 + $0x8] sm:$0xff]  ;;  %v209_v5 = vld [vmem:[%s833_s5] sm:$0xff]  ;;  %s720_s6 = smov [#allocation5]  }
  0x2e   : > { %315 = vperm.xlu1 %601, %v299_v1   ;;  %305 = vperm.xlu0 %600, %v297_v2   ;;  %v210_v6 = vld [vmem:[%s833_s5 + $0x8] sm:$0xff]  ;;  %v211_v7 = vld [vmem:[%s833_s5 + $0x10] sm:$0xff]  ;;  %v212_v8 = vld [vmem:[%s833_s5 + $0x18] sm:$0xff]  ;;  %s964_s23 = scalar_lea.hbm %s1021_s3, %s532_s21  ;;  %s638_s7 = sshll.u32 %s720_s6, 4  ;;  %s639_s7 = int_to_ptr.vmem [resolvable:$false] %s638_s7 }
  0x2f   : > { %v302_v9 = vld [vmem:[%s1019_s1 + $0x28] sm:$0xff]  ;;  %v301_v10 = vld [vmem:[%s1019_s1 + $0x20] sm:$0xff]  ;;  %v221_v11 = vadd.f32 %v211_v7, %v209_v5  ;;  %v232_v13 = vadd.f32 %v212_v8, %v210_v6  ;;  %v215_v18 = vld [vmem:[%s833_s5 + $0x30] sm:$0xff]  ;;  %s640_s8 = scalar_lea.vmem %s639_s7, 3072 }
  0x30   : > { %v213_v12 = vld [vmem:[%s833_s5 + $0x20] sm:$0xff]  ;;  %v214_v14 = vld [vmem:[%s833_s5 + $0x28] sm:$0xff]  ;;  %v216_v20 = vld [vmem:[%s833_s5 + $0x38] sm:$0xff] }
  0x31   : > { %v358_v15 = vld [vmem:[%s1020_s2 + $0x8] sm:$0xff]  ;;  %v357_v16 = vld [vmem:[%s1020_s2] sm:$0xff]  ;;  %v222_v17 = vadd.f32 %v221_v11, %v213_v12  ;;  %v233_v19 = vadd.f32 %v232_v13, %v214_v14  ;;  %v360_v21 = vld [vmem:[%s1020_s2 + $0x18] sm:$0xff] }
  0x32   : > { %320 = vperm.xlu1 %601, %v300_v3   ;;  %310 = vperm.xlu0 %600, %v298_v4   ;;  %v359_v22 = vld [vmem:[%s1020_s2 + $0x10] sm:$0xff]  ;;  %v217_v24 = vld [vmem:[%s833_s5 + $0x40] sm:$0xff]  ;;  %v218_v26 = vld [vmem:[%s833_s5 + $0x48] sm:$0xff] }
  0x33   : > { %v223_v23 = vadd.f32 %v222_v17, %v215_v18  ;;  %v234_v25 = vadd.f32 %v233_v19, %v216_v20  ;;  %v362_v27 = vld [vmem:[%s1020_s2 + $0x28] sm:$0xff]  ;;  %v361_v28 = vld [vmem:[%s1020_s2 + $0x20] sm:$0xff]  ;;  %v219_v30 = vld [vmem:[%s833_s5 + $0x50] sm:$0xff] }
  0x34   : > { %v220_v32 = vld [vmem:[%s833_s5 + $0x58] sm:$0xff]  ;;  %s945_s5 = scalar_lea.vmem [#allocation5], %s531_s29 }
  0x35   : > { %v224_v29 = vadd.f32 %v223_v23, %v217_v24  ;;  %v235_v31 = vadd.f32 %v234_v25, %v218_v26  ;;  %s433_s29 = sshll.u32 %s945_s5, 4  ;;  %s966_s29 = int_to_ptr.vmem [resolvable:$true] %s433_s29 }
  0x36   : > { %330 = vperm.xlu1 %601, %v302_v9   ;;  %325 = vperm.xlu0 %600, %v301_v10   ;;  %s634_s4 = scalar_lea.vmem %s966_s29, 1536  ;;  %p641_p1 = scmp.lt.s32.totalorder %s966_s29, %s639_s7 }
  0x37   : > { %v225_v33 = vadd.f32 %v224_v29, %v219_v30  ;;  %v236_v34 = vadd.f32 %v235_v31, %v220_v32  ;;  %p635_p8 = scmp.ne.s32.totalorder %s966_s29, %s634_s4  ;;  %p642_p3 = scmp.lt.s32.totalorder %s640_s8, %s634_s4 }
  0x39   : > { %v226_v35 = vrot.slane %v225_v33, 4  ;;  %v237_v36 = vrot.slane %v236_v34, 4  ;;  %p636_p12 = pnand %p635_p8, %p794_p9  ;;  %p643_p5 = por %p642_p3, %p641_p1 }
  0x3a   : > { %370 = vperm.xlu1 %601, %v358_v15   ;;  %365 = vperm.xlu0 %600, %v357_v16  }
  0x3b   : > { %v227_v37 = vadd.f32 %v226_v35, %v225_v33  ;;  %v238_v38 = vadd.f32 %v237_v36, %v236_v34  ;;  %p637_p0 = pneg %p636_p12 }
  0x3d   : > { %v228_v39 = vrot.slane %v227_v37, 2  ;;  %v239_v40 = vrot.slane %v238_v38, 2  ;;  %p644_p6 = pnand %p643_p5, %p637_p0 }
  0x3e   : > { %380 = vperm.xlu1 %601, %v360_v21   ;;  %375 = vperm.xlu0 %600, %v359_v22  }
  0x3f   : > { %v229_v41 = vadd.f32 %v228_v39, %v227_v37  ;;  %v240_v42 = vadd.f32 %v239_v40, %v238_v38 }
  0x41   : > { %v230_v43 = vrot.slane %v229_v41, 1  ;;  %v241_v44 = vrot.slane %v240_v42, 1 }
  0x42   : > { %390 = vperm.xlu1 %601, %v362_v27   ;;  %385 = vperm.xlu0 %600, %v361_v28  }
  0x43   : > { %v231_v45 = vadd.f32 %v230_v43, %v229_v41  ;;  %v242_v46 = vadd.f32 %v241_v44, %v240_v42 }
  0x45   : > { %v243_v47 = vmul.f32 0.020833334, %v231_v45  ;;  %v244_v48 = vmul.f32 0.020833334, %v242_v46 }
  0x47   : > { %v887_v49 = vsub.f32 %v209_v5, %v243_v47  ;;  %v889_v50 = vsub.f32 %v211_v7, %v243_v47  ;;  %v891_v51 = vsub.f32 %v210_v6, %v244_v48  ;;  %v893_v52 = vsub.f32 %v212_v8, %v244_v48 }
  0x48   : > { %v895_v53 = vsub.f32 %v213_v12, %v243_v47  ;;  %v901_v56 = vsub.f32 %v214_v14, %v244_v48  ;;  %v907_v59 = vsub.f32 %v215_v18, %v243_v47  ;;  %v911_v62 = vsub.f32 %v216_v20, %v244_v48 }
  0x49   : > { %v257_v54 = vmul.f32 %v887_v49, %v887_v49  ;;  %v259_v55 = vmul.f32 %v889_v50, %v889_v50  ;;  %v258_v57 = vmul.f32 %v891_v51, %v891_v51  ;;  %v260_v58 = vmul.f32 %v893_v52, %v893_v52 }
  0x4a   : > { %v261_v60 = vmul.f32 %v895_v53, %v895_v53  ;;  %v262_v63 = vmul.f32 %v901_v56, %v901_v56  ;;  %v915_v1 = vsub.f32 %v217_v24, %v243_v47  ;;  %v263_v2 = vmul.f32 %v907_v59, %v907_v59 }
  0x4b   : > { %v269_v61 = vadd.f32 %v259_v55, %v257_v54  ;;  %v280_v0 = vadd.f32 %v260_v58, %v258_v57  ;;  %v919_v4 = vsub.f32 %v218_v26, %v244_v48  ;;  %v264_v5 = vmul.f32 %v911_v62, %v911_v62 }
  0x4c   : > { %v923_v7 = vsub.f32 %v219_v30, %v243_v47  ;;  %v265_v8 = vmul.f32 %v915_v1, %v915_v1  ;;  %v927_v10 = vsub.f32 %v220_v32, %v244_v48 }
  0x4d   : > { %v270_v3 = vadd.f32 %v269_v61, %v261_v60  ;;  %v281_v6 = vadd.f32 %v280_v0, %v262_v63  ;;  %v266_v11 = vmul.f32 %v919_v4, %v919_v4 }
  0x4e   : > { %v267_v13 = vmul.f32 %v923_v7, %v923_v7  ;;  %v268_v15 = vmul.f32 %v927_v10, %v927_v10 }
  0x4f   : > { %v271_v9 = vadd.f32 %v270_v3, %v263_v2  ;;  %v282_v12 = vadd.f32 %v281_v6, %v264_v5 }
  0x51   : > { %v272_v14 = vadd.f32 %v271_v9, %v265_v8  ;;  %v283_v16 = vadd.f32 %v282_v12, %v266_v11 }
  0x53   : > { %v273_v17 = vadd.f32 %v272_v14, %v267_v13  ;;  %v284_v18 = vadd.f32 %v283_v16, %v268_v15 }
  0x55   : > { %v274_v19 = vrot.slane %v273_v17, 4  ;;  %v285_v20 = vrot.slane %v284_v18, 4 }
  0x57   : > { %v275_v21 = vadd.f32 %v274_v19, %v273_v17  ;;  %v286_v22 = vadd.f32 %v285_v20, %v284_v18 }
  0x59   : > { %v276_v23 = vrot.slane %v275_v21, 2  ;;  %v287_v24 = vrot.slane %v286_v22, 2 }
  0x5b   : > { %v277_v25 = vadd.f32 %v276_v23, %v275_v21  ;;  %v288_v26 = vadd.f32 %v287_v24, %v286_v22 }
  0x5d   : > { %v278_v27 = vrot.slane %v277_v25, 1  ;;  %v289_v28 = vrot.slane %v288_v26, 1 }
  0x5f   : > { %v279_v29 = vadd.f32 %v278_v27, %v277_v25  ;;  %v290_v30 = vadd.f32 %v289_v28, %v288_v26 }
  0x61   : > { %v291_v31 = vmul.f32 0.020833334, %v279_v29  ;;  %v292_v32 = vmul.f32 0.020833334, %v290_v30 }
  0x63   : > { %v293_v33 = vadd.f32 1e-05, %v291_v31  ;;  %v294_v34 = vadd.f32 1e-05, %v292_v32 }
  0x65   : > { %602 = vrsqrt.f32 %v293_v33 }
  0x66   : > { %604 = vrsqrt.f32 %v294_v34 }
  0x72   : > { %v603_v37 = vpop.eup %602 }
  0x73   : > { %v605_v38 = vpop.eup %604 }
  0xa9   : > { %v316_v35 = vpop.permute.xlu1 %315  ;;  %v306_v36 = vpop.permute.xlu0 %305 }
  0xaa   : > { %v333_v41 = vmul.f32 %v603_v37, %v306_v36  ;;  %v334_v42 = vmul.f32 %v605_v38, %v306_v36  ;;  %v337_v47 = vmul.f32 %v603_v37, %v316_v35  ;;  %v338_v48 = vmul.f32 %v605_v38, %v316_v35 }
  0xac   : > { %v345_v60 = vmul.f32 %v333_v41, %v887_v49  ;;  %v346_v61 = vmul.f32 %v334_v42, %v891_v51 }
  0xad   : > { %v321_v39 = vpop.permute.xlu1 %320  ;;  %v311_v40 = vpop.permute.xlu0 %310 }
  0xae   : > { %v335_v43 = vmul.f32 %v603_v37, %v311_v40  ;;  %v336_v44 = vmul.f32 %v605_v38, %v311_v40  ;;  %v339_v54 = vmul.f32 %v603_v37, %v321_v39  ;;  %v340_v55 = vmul.f32 %v605_v38, %v321_v39 }
  0xb0   : > { %v347_v57 = vmul.f32 %v335_v43, %v889_v50  ;;  %v348_v58 = vmul.f32 %v336_v44, %v893_v52  ;;  %v351_v8 = vmul.f32 %v339_v54, %v907_v59  ;;  %v352_v9 = vmul.f32 %v340_v55, %v911_v62 }
  0xb1   : > { %v331_v45 = vpop.permute.xlu1 %330  ;;  %v326_v46 = vpop.permute.xlu0 %325  ;;  %v349_v50 = vmul.f32 %v337_v47, %v895_v53  ;;  %v350_v52 = vmul.f32 %v338_v48, %v901_v56 }
  0xb2   : > { %v343_v11 = vmul.f32 %v603_v37, %v331_v45  ;;  %v344_v49 = vmul.f32 %v605_v38, %v331_v45  ;;  %v341_v12 = vmul.f32 %v603_v37, %v326_v46  ;;  %v342_v13 = vmul.f32 %v605_v38, %v326_v46 }
  0xb4   : > { %v355_v15 = vmul.f32 %v343_v11, %v923_v7  ;;  %v356_v16 = vmul.f32 %v344_v49, %v927_v10  ;;  %v353_v17 = vmul.f32 %v341_v12, %v915_v1  ;;  %v354_v18 = vmul.f32 %v342_v13, %v919_v4 }
  0xb5   : > { %v371_v63 = vpop.permute.xlu1 %370  ;;  %v366_v0 = vpop.permute.xlu0 %365 }
  0xb6   : > { %v395_v2 = vadd.f32 %v371_v63, %v347_v57  ;;  %v396_v3 = vadd.f32 %v371_v63, %v348_v58  ;;  %v393_v5 = vadd.f32 %v366_v0, %v345_v60  ;;  %v394_v6 = vadd.f32 %v366_v0, %v346_v61 }
  0xb8   : > { %407 = vst [vmem:[%s945_s5 + $0x10] sm:$0xff] %v395_v2  ;;  %408 = vst [vmem:[%s945_s5 + $0x18] sm:$0xff] %v396_v3 }
  0xb9   : > { %405 = vst [vmem:[%s945_s5] sm:$0xff] %v393_v5  ;;  %406 = vst [vmem:[%s945_s5 + $0x8] sm:$0xff] %v394_v6  ;;  %v381_v51 = vpop.permute.xlu1 %380  ;;  %v376_v53 = vpop.permute.xlu0 %375 }
  0xba   : > { %v399_v56 = vadd.f32 %v381_v51, %v351_v8  ;;  %v400_v59 = vadd.f32 %v381_v51, %v352_v9  ;;  %v397_v62 = vadd.f32 %v376_v53, %v349_v50  ;;  %v398_v14 = vadd.f32 %v376_v53, %v350_v52 }
  0xbc   : > { %411 = vst [vmem:[%s945_s5 + $0x30] sm:$0xff] %v399_v56  ;;  %412 = vst [vmem:[%s945_s5 + $0x38] sm:$0xff] %v400_v59 }
  0xbd   : > { %409 = vst [vmem:[%s945_s5 + $0x20] sm:$0xff] %v397_v62  ;;  %410 = vst [vmem:[%s945_s5 + $0x28] sm:$0xff] %v398_v14  ;;  %v391_v19 = vpop.permute.xlu1 %390  ;;  %v386_v20 = vpop.permute.xlu0 %385 }
  0xbe   : > { %v403_v7 = vadd.f32 %v391_v19, %v355_v15  ;;  %v404_v21 = vadd.f32 %v391_v19, %v356_v16  ;;  %v401_v10 = vadd.f32 %v386_v20, %v353_v17  ;;  %v402_v22 = vadd.f32 %v386_v20, %v354_v18 }
  0xc0   : > { %415 = vst [vmem:[%s945_s5 + $0x50] sm:$0xff] %v403_v7  ;;  %416 = vst [vmem:[%s945_s5 + $0x58] sm:$0xff] %v404_v21 }
  0xc1   : > { %413 = vst [vmem:[%s945_s5 + $0x40] sm:$0xff] %v401_v10  ;;  %414 = vst [vmem:[%s945_s5 + $0x48] sm:$0xff] %v402_v22 }
  0xc2   : > { %647 = shalt.err (!%p644_p6)
}
  0xc3   : > { %s648_s24 = scalar_lea.hbm %s964_s23, 1536  ;;  %s652_s11 = scalar_lea.hbm %s1021_s3, 3072 }
  0xc4   : > { %p649_p4 = scmp.ne.s32.totalorder %s964_s23, %s648_s24  ;;  %p653_p13 = scmp.lt.s32.totalorder %s964_s23, %s1021_s3 }
  0xc5   : > { %p654_p2 = scmp.lt.s32.totalorder %s652_s11, %s648_s24 }
  0xc6   : > { %p650_p7 = pnand %p649_p4, %p794_p9 }
  0xc7   : > { %p655_p8 = por %p654_p2, %p653_p13 }
  0xc8   : > { %p651_p10 = pneg %p650_p7 }
  0xca   : > { %p656_p12 = pnand %p655_p8, %p651_p10 }
  0xcc   : > { %659 = shalt.err (!%p656_p12)
}
  0xcd   : > { %s721_s5 = smov 256   ;;  %s722_s21 = smov 16  }
  0xce   : > { %535 = dma.vmem_to_hbm [thread:$0]  (%p794_p9), %s966_s29, 1536, %s964_s23, %s418_s30, %s721_s5, %s721_s5, %s722_s21  }
  0xcf PF: > { %s448_s15 = sand.u32 1, %s694_s12   ;;  %p1027_p0 = scmp.ge.s32.totalorder %s714_s17, 2 }
  0xd0   : > { %s449_s22 = scalar_lea.sflag [#allocation4], %s448_s15 }
  0xd1   : > { %p542_p1 = pnand %p1027_p0, %p801_p11 }
  0xd3   : > { %p543_p3 = pneg %p542_p1 }
  0xd5   : > { %689 = dma.done.wait (%p543_p3), %s449_s22, 1536  }
  0xd6   : > { %691 = vsyncadd (%p543_p3), %s449_s22, 4294965760  ;;  %s19_s17 = sadd.s32 1, %s714_s17   ;;  %s1028_s12 = smov %s698_s13 }
  0xd7   : > { %p16_p5 = scmp.ge.s32.totalorder %s19_s17, 4   ;;  %s1029_s13 = smov %s702_s14 }
  0xd8   : > { %s1030_s14 = smov %s799_s26  ;;  %s1031_s15 = smov %s710_s16 }
  0xd9   : > { %s1032_s16 = smov %s1034_s20  ;;  %18 = sbr.rel (!%p16_p5) target bundleno = 6 (0x6), region = 77 }
  0xde   :  { %454 = vsyncpa [#allocation3], 1 }
  0xdf   :  { %456 = vsyncpa [#allocation3 + $0x1], 1 }
  0xe0   :  { %457 = vsyncpa [#allocation4], 1 }
  0xe1   :  { %459 = vsyncpa [#allocation4 + $0x1], 1 }

</bundles_post_ra>
